<compile_context>
chip_gen: v5e
topology: v5e:2x2
jax: 0.10.0
libtpu: 0.0.40
codegen_flags: <defaults>
</compile_context>

<pallas_src>
import functools

import jax
import jax.numpy as jnp
from jax import lax
from jax.experimental import pallas as pl
from jax.experimental.pallas import tpu as pltpu


# -------------------------- hardware / tiling helpers ------------------------

def _vmem_capacity_bytes() -> int:
    """Per-core VMEM capacity; conservative v7x (64 MiB) fallback on failure."""
    try:
        info = pltpu.get_tpu_info()
        cap = getattr(info, "vmem_capacity_bytes", None)
        if cap:
            return int(cap)
    except Exception:
        pass
    return 64 << 20


def _block_bytes(L: int, tn: int, itemsize: int) -> int:
    # x block + y block, double-buffered, plus two f32 working slabs (x_f32, xc).
    return L * tn * itemsize * 2 * 2 + L * tn * 4 * 2


def _pick_n_tile(B: int, L: int, N: int, itemsize: int, vmem_cap: int) -> int:
    """Lane-dense N tile.

    * N <= 128: full extent (single block on the lane axis).
    * N  > 128: multiple of 128 (partial last block allowed via pl.cdiv grid),
      chosen so the per-step block fits a generation-aware VMEM budget and the
      grid has >= 4 steps (pipeline depth / 2-TC sharding) when achievable.
    """
    if N <= 128:
        return N
    budget = int(vmem_cap * 0.375)
    candidates = []
    if N % 128 == 0:
        candidates.append(N)
    candidates += [2048, 1024, 512, 256, 128]
    candidates = sorted({t for t in candidates if t <= N}, reverse=True)
    fits = [t for t in candidates if _block_bytes(L, t, itemsize) <= budget]
    if not fits:
        return 128
    for tn in fits:  # largest (fewest steps) first
        if B * pl.cdiv(N, tn) >= 4:
            return tn
    return fits[-1]  # smallest fitting tile -> most grid steps


def _vmem_limit_bytes(L: int, tn: int, in_itemsize: int, out_itemsize: int,
                      vmem_cap: int) -> int:
    io = L * tn * (in_itemsize + out_itemsize) * 2   # double-buffered x + y
    work = L * tn * 4 * 2                            # f32 intermediates
    small = tn * 4 * 32                              # stats / affine vectors
    total = io + work + small + (2 << 20)
    cap = int(vmem_cap * 0.75)                       # ~48 MiB on v7x, ~96 MiB on v5e/v6e
    return int(min(max(total, 16 << 20), cap))


# -------------------------- kernels -----------------------------------------

def _revin_norm_kernel(*refs, eps, affine):
    if affine:
        x_ref, w_ref, b_ref, y_ref, mean_ref, std_ref = refs
    else:
        x_ref, y_ref, mean_ref, std_ref = refs
        w_ref = b_ref = None

    x = x_ref[...].astype(jnp.float32)                      # (1, L, TN)
    mean = jnp.mean(x, axis=1, keepdims=True)               # (1, 1, TN)
    xc = x - mean                                           # reused: var + normalize
    var = jnp.mean(xc * xc, axis=1, keepdims=True)          # biased var (unbiased=False)
    var_eps = var + eps
    stdev = jnp.sqrt(var_eps)                               # (1, 1, TN) — EUP
    inv_std = lax.rsqrt(var_eps)                            # (1, 1, TN) — EUP, frees VALU
    y = xc * inv_std
    if affine:
        y = y * w_ref[...] + b_ref[...]
    y_ref[...] = y.astype(y_ref.dtype)
    mean_ref[...] = mean.astype(mean_ref.dtype)
    std_ref[...] = stdev.astype(std_ref.dtype)


def _revin_denorm_kernel(*refs, affine):
    if affine:
        x_ref, inv_w_ref, b_ref, mean_ref, std_ref, y_ref = refs
    else:
        x_ref, mean_ref, std_ref, y_ref = refs
        inv_w_ref = b_ref = None

    x = x_ref[...].astype(jnp.float32)                      # (1, L, TN)
    if affine:
        # inv_w precomputed in the wrapper: pure VPU multiply-add here.
        x = (x - b_ref[...]) * inv_w_ref[...]
    y = x * std_ref[...] + mean_ref[...]
    y_ref[...] = y.astype(y_ref.dtype)


# -------------------------- wrappers -----------------------------------------

def revin_norm(x, weight=None, bias=None, *, eps=1e-5, affine=True):
    """x: (B, L, N) -> (y, mean, stdev) with mean/stdev shaped (B, 1, N)."""
    B, L, N = x.shape
    itemsize = jnp.dtype(x.dtype).itemsize
    vmem_cap = _vmem_capacity_bytes()
    tn = _pick_n_tile(B, L, N, itemsize, vmem_cap)
    grid = (B, pl.cdiv(N, tn))

    x_spec = pl.BlockSpec((1, L, tn), lambda i, j: (i, 0, j))
    vec_in = pl.BlockSpec((1, 1, tn), lambda i, j: (0, 0, j))
    vec_out = pl.BlockSpec((1, 1, tn), lambda i, j: (i, 0, j))

    in_specs = [x_spec]
    args = [x]
    if affine:
        in_specs += [vec_in, vec_in]
        args += [weight.reshape(1, 1, N).astype(jnp.float32),
                 bias.reshape(1, 1, N).astype(jnp.float32)]

    bytes_accessed = (x.size * itemsize                       # read x
                      + x.size * itemsize                     # write y
                      + 2 * B * N * 4                         # mean / stdev
                      + (2 * N * 4 if affine else 0))
    cost = pl.CostEstimate(flops=6 * B * L * N,
                           transcendentals=2 * B * N,
                           bytes_accessed=bytes_accessed)

    kern = functools.partial(_revin_norm_kernel, eps=eps, affine=affine)
    y, mean, stdev = pl.pallas_call(
        kern,
        out_shape=(
            jax.ShapeDtypeStruct((B, L, N), x.dtype),
            jax.ShapeDtypeStruct((B, 1, N), jnp.float32),
            jax.ShapeDtypeStruct((B, 1, N), jnp.float32),
        ),
        grid_spec=pltpu.PrefetchScalarGridSpec(
            num_scalar_prefetch=0,
            grid=grid,
            in_specs=in_specs,
            out_specs=[x_spec, vec_out, vec_out],
        ),
        compiler_params=pltpu.CompilerParams(
            dimension_semantics=("parallel", "parallel"),
            vmem_limit_bytes=_vmem_limit_bytes(L, tn, itemsize, itemsize,
                                               vmem_cap),
        ),
        cost_estimate=cost,
    )(*args)
    return y, mean, stdev


def revin_denorm(x, weight=None, bias=None, mean=None, stdev=None,
                 *, eps=1e-5, affine=True):
    """x: (B, L, N), mean/stdev: (B, 1, N) -> denormalized (B, L, N)."""
    B, L, N = x.shape
    itemsize = jnp.dtype(x.dtype).itemsize
    vmem_cap = _vmem_capacity_bytes()
    tn = _pick_n_tile(B, L, N, itemsize, vmem_cap)
    grid = (B, pl.cdiv(N, tn))

    x_spec = pl.BlockSpec((1, L, tn), lambda i, j: (i, 0, j))
    vec_in = pl.BlockSpec((1, 1, tn), lambda i, j: (0, 0, j))
    vec_b = pl.BlockSpec((1, 1, tn), lambda i, j: (i, 0, j))

    in_specs = [x_spec]
    args = [x]
    if affine:
        # Hoist the reciprocal out of the kernel: one O(N) divide total instead
        # of one per (batch, N-tile) grid step.
        inv_w = (1.0 / (weight.astype(jnp.float32) + eps * eps)).reshape(1, 1, N)
        in_specs += [vec_in, vec_in]
        args += [inv_w, bias.reshape(1, 1, N).astype(jnp.float32)]
    in_specs += [vec_b, vec_b]
    args += [mean, stdev]

    bytes_accessed = (x.size * itemsize * 2
                      + 2 * B * N * 4
                      + (2 * N * 4 if affine else 0))
    cost = pl.CostEstimate(flops=4 * B * L * N,
                           transcendentals=0,
                           bytes_accessed=bytes_accessed)

    kern = functools.partial(_revin_denorm_kernel, affine=affine)
    y = pl.pallas_call(
        kern,
        out_shape=jax.ShapeDtypeStruct((B, L, N), x.dtype),
        grid_spec=pltpu.PrefetchScalarGridSpec(
            num_scalar_prefetch=0,
            grid=grid,
            in_specs=in_specs,
            out_specs=x_spec,
        ),
        compiler_params=pltpu.CompilerParams(
            dimension_semantics=("parallel", "parallel"),
            vmem_limit_bytes=_vmem_limit_bytes(L, tn, itemsize, itemsize,
                                               vmem_cap),
        ),
        cost_estimate=cost,
    )(*args)
    return y


class RevIN:
    """JAX/Pallas port of the PyTorch RevIN module (forward only)."""

    def __init__(self, num_features: int, eps=1e-5, affine=True):
        self.num_features = num_features
        self.eps = eps
        self.affine = affine
        if affine:
            # Deterministic init, matching nn.Parameter(torch.ones/zeros(N)).
            self.affine_weight = jnp.ones((num_features,), jnp.float32)
            self.affine_bias = jnp.zeros((num_features,), jnp.float32)
        else:
            self.affine_weight = None
            self.affine_bias = None
        self.mean = None
        self.stdev = None

    def __call__(self, x, mode: str):
        if mode == "norm":
            y, self.mean, self.stdev = revin_norm(
                x, self.affine_weight, self.affine_bias,
                eps=self.eps, affine=self.affine)
            return y
        elif mode == "denorm":
            return revin_denorm(
                x, self.affine_weight, self.affine_bias,
                self.mean, self.stdev, eps=self.eps, affine=self.affine)
        else:
            raise NotImplementedError


# -------------------------- demo / check ------------------------------------

def _reference_norm(x, w, b, eps, affine):
    mean = jnp.mean(x, axis=1, keepdims=True)
    std = jnp.sqrt(jnp.var(x, axis=1, keepdims=True) + eps)
    y = (x - mean) / std
    if affine:
        y = y * w + b
    return y, mean, std


def _reference_denorm(x, w, b, mean, std, eps, affine):
    if affine:
        x = (x - b) / (w + eps * eps)
    return x * std + mean


if __name__ == "__main__":
    key = jax.random.PRNGKey(0)
    B, L, N = 2, 8, 32
    x = jax.random.normal(key, (B, L, N), jnp.float32) * 3.0 + 1.5

    # Affine path.
    revin = RevIN(num_features=N, eps=1e-5, affine=True)
    y = revin(x, "norm")
    jax.block_until_ready(y)
    x_rec = revin(y, "denorm")
    jax.block_until_ready(x_rec)

    w = revin.affine_weight.reshape(1, 1, N)
    b = revin.affine_bias.reshape(1, 1, N)
    y_ref, mean_ref, std_ref = _reference_norm(x, w, b, revin.eps, True)
    x_rec_ref = _reference_denorm(y_ref, w, b, mean_ref, std_ref, revin.eps, True)

    assert jnp.allclose(y, y_ref, atol=1e-5, rtol=1e-5)
    assert jnp.allclose(revin.mean, mean_ref, atol=1e-5, rtol=1e-5)
    assert jnp.allclose(revin.stdev, std_ref, atol=1e-5, rtol=1e-5)
    assert jnp.allclose(x_rec, x_rec_ref, atol=1e-4, rtol=1e-4)
    assert jnp.allclose(x_rec, x, atol=1e-3, rtol=1e-3)

    # Non-affine path (no weight/bias DMAs).
    revin_na = RevIN(num_features=N, eps=1e-5, affine=False)
    y_na = revin_na(x, "norm")
    jax.block_until_ready(y_na)
    x_na = revin_na(y_na, "denorm")
    jax.block_until_ready(x_na)

    y_na_ref, mean_na_ref, std_na_ref = _reference_norm(x, None, None, 1e-5, False)
    assert jnp.allclose(y_na, y_na_ref, atol=1e-5, rtol=1e-5)
    assert jnp.allclose(x_na, x, atol=1e-3, rtol=1e-3)

    print("KERNEL_OK")
</pallas_src>

<mosaic_0001>
module attributes {stable_mosaic.version = 11 : i64} {
  func.func @_revin_norm_kernel(%arg0: i32, %arg1: i32, %arg2: memref<1x8x32xf32, #tpu.memory_space<vmem>>, %arg3: memref<1x1x32xf32, #tpu.memory_space<vmem>>, %arg4: memref<1x1x32xf32, #tpu.memory_space<vmem>>, %arg5: memref<1x8x32xf32, #tpu.memory_space<vmem>>, %arg6: memref<1x1x32xf32, #tpu.memory_space<vmem>>, %arg7: memref<1x1x32xf32, #tpu.memory_space<vmem>>) attributes {dimension_semantics = [#tpu.dimension_semantics<parallel>, #tpu.dimension_semantics<parallel>], iteration_bounds = array<i64: 2, 1>, scalar_prefetch = 0 : i64, scratch_operands = 0 : i64, tpu.core_type = #tpu.core_type<tc>, window_params = [{transform_indices = @transform_0, window_bounds = array<i64: 1, 8, 32>}, {transform_indices = @transform_1, window_bounds = array<i64: 1, 1, 32>}, {transform_indices = @transform_2, window_bounds = array<i64: 1, 1, 32>}, {transform_indices = @transform_3, window_bounds = array<i64: 1, 8, 32>}, {transform_indices = @transform_4, window_bounds = array<i64: 1, 1, 32>}, {transform_indices = @transform_5, window_bounds = array<i64: 1, 1, 32>}]} {
    %c0 = arith.constant 0 : index
    %c0_0 = arith.constant 0 : index
    %c0_1 = arith.constant 0 : index
    %0 = vector.load %arg2[%c0, %c0_0, %c0_1] : memref<1x8x32xf32, #tpu.memory_space<vmem>>, vector<1x8x32xf32>
    %cst = arith.constant dense<0.000000e+00> : vector<1x32xf32>
    %1 = vector.multi_reduction <add>, %0, %cst [1] : vector<1x8x32xf32> to vector<1x32xf32>
    %2 = vector.shape_cast %1 : vector<1x32xf32> to vector<1x1x32xf32>
    %cst_2 = arith.constant 8.000000e+00 : f32
    %3 = vector.broadcast %cst_2 : f32 to vector<1x1x32xf32>
    %4 = arith.divf %2, %3 : vector<1x1x32xf32>
    %5 = vector.broadcast %4 : vector<1x1x32xf32> to vector<1x8x32xf32>
    %6 = arith.subf %0, %5 : vector<1x8x32xf32>
    %7 = arith.mulf %6, %6 : vector<1x8x32xf32>
    %cst_3 = arith.constant dense<0.000000e+00> : vector<1x32xf32>
    %8 = vector.multi_reduction <add>, %7, %cst_3 [1] : vector<1x8x32xf32> to vector<1x32xf32>
    %9 = vector.shape_cast %8 : vector<1x32xf32> to vector<1x1x32xf32>
    %cst_4 = arith.constant 8.000000e+00 : f32
    %10 = vector.broadcast %cst_4 : f32 to vector<1x1x32xf32>
    %11 = arith.divf %9, %10 : vector<1x1x32xf32>
    %cst_5 = arith.constant 9.99999974E-6 : f32
    %12 = vector.broadcast %cst_5 : f32 to vector<1x1x32xf32>
    %13 = arith.addf %11, %12 : vector<1x1x32xf32>
    %14 = math.sqrt %13 : vector<1x1x32xf32>
    %15 = math.rsqrt %13 : vector<1x1x32xf32>
    %16 = vector.broadcast %15 : vector<1x1x32xf32> to vector<1x8x32xf32>
    %17 = arith.mulf %6, %16 : vector<1x8x32xf32>
    %c0_6 = arith.constant 0 : index
    %c0_7 = arith.constant 0 : index
    %c0_8 = arith.constant 0 : index
    %18 = vector.load %arg3[%c0_6, %c0_7, %c0_8] : memref<1x1x32xf32, #tpu.memory_space<vmem>>, vector<1x1x32xf32>
    %19 = vector.broadcast %18 : vector<1x1x32xf32> to vector<1x8x32xf32>
    %20 = arith.mulf %17, %19 : vector<1x8x32xf32>
    %c0_9 = arith.constant 0 : index
    %c0_10 = arith.constant 0 : index
    %c0_11 = arith.constant 0 : index
    %21 = vector.load %arg4[%c0_9, %c0_10, %c0_11] : memref<1x1x32xf32, #tpu.memory_space<vmem>>, vector<1x1x32xf32>
    %22 = vector.broadcast %21 : vector<1x1x32xf32> to vector<1x8x32xf32>
    %23 = arith.addf %20, %22 : vector<1x8x32xf32>
    %c0_12 = arith.constant 0 : index
    %c0_13 = arith.constant 0 : index
    %c0_14 = arith.constant 0 : index
    %24 = vector.load %arg5[%c0_12, %c0_13, %c0_14] : memref<1x8x32xf32, #tpu.memory_space<vmem>>, vector<1x8x32xf32>
    tpu.vector_store %arg5[%c0_12, %c0_13, %c0_14], %23 {strides = array<i32>} : memref<1x8x32xf32, #tpu.memory_space<vmem>>, vector<1x8x32xf32>,
    %c0_15 = arith.constant 0 : index
    %c0_16 = arith.constant 0 : index
    %c0_17 = arith.constant 0 : index
    %25 = vector.load %arg6[%c0_15, %c0_16, %c0_17] : memref<1x1x32xf32, #tpu.memory_space<vmem>>, vector<1x1x32xf32>
    tpu.vector_store %arg6[%c0_15, %c0_16, %c0_17], %4 {strides = array<i32>} : memref<1x1x32xf32, #tpu.memory_space<vmem>>, vector<1x1x32xf32>,
    %c0_18 = arith.constant 0 : index
    %c0_19 = arith.constant 0 : index
    %c0_20 = arith.constant 0 : index
    %26 = vector.load %arg7[%c0_18, %c0_19, %c0_20] : memref<1x1x32xf32, #tpu.memory_space<vmem>>, vector<1x1x32xf32>
    tpu.vector_store %arg7[%c0_18, %c0_19, %c0_20], %14 {strides = array<i32>} : memref<1x1x32xf32, #tpu.memory_space<vmem>>, vector<1x1x32xf32>,
    return
  }
  func.func @transform_0(%arg0: i32, %arg1: i32) -> (i32, i32, i32) {
    %c0_i32 = arith.constant 0 : i32
    %c0_i32_0 = arith.constant 0 : i32
    return %arg0, %c0_i32, %arg1 : i32, i32, i32
  }
  func.func @transform_1(%arg0: i32, %arg1: i32) -> (i32, i32, i32) {
    %c0_i32 = arith.constant 0 : i32
    %c0_i32_0 = arith.constant 0 : i32
    %c0_i32_1 = arith.constant 0 : i32
    return %c0_i32, %c0_i32_0, %arg1 : i32, i32, i32
  }
  func.func @transform_2(%arg0: i32, %arg1: i32) -> (i32, i32, i32) {
    %c0_i32 = arith.constant 0 : i32
    %c0_i32_0 = arith.constant 0 : i32
    %c0_i32_1 = arith.constant 0 : i32
    return %c0_i32, %c0_i32_0, %arg1 : i32, i32, i32
  }
  func.func @transform_3(%arg0: i32, %arg1: i32) -> (i32, i32, i32) {
    %c0_i32 = arith.constant 0 : i32
    %c0_i32_0 = arith.constant 0 : i32
    return %arg0, %c0_i32, %arg1 : i32, i32, i32
  }
  func.func @transform_4(%arg0: i32, %arg1: i32) -> (i32, i32, i32) {
    %c0_i32 = arith.constant 0 : i32
    %c0_i32_0 = arith.constant 0 : i32
    return %arg0, %c0_i32, %arg1 : i32, i32, i32
  }
  func.func @transform_5(%arg0: i32, %arg1: i32) -> (i32, i32, i32) {
    %c0_i32 = arith.constant 0 : i32
    %c0_i32_0 = arith.constant 0 : i32
    return %arg0, %c0_i32, %arg1 : i32, i32, i32
  }
}

</mosaic_0001>

<bundles_post_ra>
// kernel: tpu_custom_call.1
= control target key start
LH: loop header
LB: loop body
LE: loop exit
PB: predicated region body
PF: predicated region fallthrough
CT: control target
= control target key end

     0   :  { %s1149_s0 = inlined_call_operand.hbm [shape: f32[2,8,32], index: 0, kind: input, shape index: {}]   ;;  %s1150_s1 = inlined_call_operand.hbm [shape: f32[1,1,32], index: 1, kind: input, shape index: {}]   ;;  %s1151_s2 = inlined_call_operand.vmem [shape: f32[1,1,32], index: 2, kind: input, shape index: {}]   ;;  %s1152_s3 = inlined_call_operand.hbm [shape: f32[2,8,32], index: 3, kind: output, shape index: {0}]   ;;  %s1153_s4 = inlined_call_operand.hbm [shape: f32[2,1,32], index: 4, kind: output, shape index: {1}]   ;;  %s1154_s5 = inlined_call_operand.hbm [shape: f32[2,1,32], index: 5, kind: output, shape index: {2}]  }
   0x1   :  { %1156 = sst [smem:[#allocation15_spill]] %s1150_s1 }
   0x2   :  { %11 = vsyncpa [#allocation3], 0 }
   0x3   :  { %13 = vsyncpa [#allocation3 + $0x1], 0 }
   0x4   :  { %14 = vsyncpa [#allocation6], 0 }
   0x5   :  { %15 = vsyncpa [#allocation4], 0 }
   0x6   :  { %17 = vsyncpa [#allocation4 + $0x1], 0 }
   0x7   :  { %18 = vsyncpa [#allocation9], 0 }
   0x8   :  { %20 = vsyncpa [#allocation9 + $0x1], 0  ;;  %s936_s18 = smov 0   ;;  %s938_s19 = smov 0  }
   0x9   :  { %s940_s20 = smov 0   ;;  %s942_s21 = smov 0  }
   0xa   :  { %s944_s22 = smov 0   ;;  %s946_s23 = smov 0  }
   0xb LB: > { %s967_s24 = sadd.s32 4294967295, %s902_s23   ;;  %s1155_s25 = sadd.s32 4294967294, %s902_s23   ;;  %s902_s23 = sphi %s946_s23, %s26_s23   ;;  %s898_s22 = sphi %s944_s22, %s1168_s22   ;;  %s894_s21 = sphi %s942_s21, %s1167_s21   ;;  %s890_s20 = sphi %s940_s20, %s1166_s20   ;;  %s886_s19 = sphi %s938_s19, %s1165_s19   ;;  %s882_s18 = sphi %s936_s18, %s1164_s18  }
   0xc   : > { %p60_p0 = scmp.ne.s32.totalorder %s886_s19, %s882_s18  ;;  %p61_p1 = scmp.eq.s32.totalorder %s967_s24, 0 }
   0xd   : > { %p138_p2 = scmp.eq.s32.totalorder %s967_s24, 1  ;;  %p144_p3 = scmp.eq.s32.totalorder %s1155_s25, 1 }
   0xe   : > { %p978_p4 = por %p61_p1, %p60_p0  ;;  %p592_p5 = scmp.ge.s32.totalorder %s902_s23, 1 }
   0xf   : > { %p983_p6 = por %p144_p3, %p60_p0  ;;  %p207_p7 = scmp.lt.s32.totalorder %s902_s23, 3 }
  0x10   : > { %s1159_s1 = sld [smem:[#allocation15_spill]]  ;;  %p595_p9 = scmp.ge.s32.totalorder %s902_s23, 2 }
  0x11   : > { %p991_p8 = pnand %p592_p5, %p207_p7  ;;  %s904_s7 = smov [#allocation5]  }
  0x12   : > { %s222_s8 = sshll.u32 %s904_s7, 4  ;;  %s38_s9 = sadd.s32 1, %s898_s22  ;;  %s223_s8 = int_to_ptr.vmem [resolvable:$true] %s222_s8 }
  0x13   : > { %p618_p10 = pneg %p991_p8  ;;  %p40_p12 = scmp.ge.s32.totalorder %s38_s9, 2 }
  0x14   : > { %s47_s10 = sadd.s32 1, %s890_s20  ;;  %p54_p13 = scmp.ne.s32.totalorder %s890_s20, %s886_s19 }
  0x15   : > { %p619_p11 = pnand %p618_p10, %p61_p1  ;;  %p55_p0 = scmp.eq.s32.totalorder %s902_s23, 0 }
  0x16   : > { %s220_s30 = sshll.u32 %s1159_s1, 4  ;;  %s1170_s9 = smov (%p40_p12, %s38_s9), 0  ;;  %s221_s30 = int_to_ptr.hbm [resolvable:$true] %s220_s30 }
  0x17   : > { %621 = dma.hbm_to_vmem [thread:$0]  (!%p619_p11), %s221_s30, 16, %s223_s8, [#allocation6]  }
  0x18   : > { %p1007_p3 = por %p55_p0, %p54_p13  ;;  %p1013_p5 = por %p138_p2, %p54_p13 }
  0x19   : > { %s42_s13 = ssub.s32 %s898_s22, %s1170_s9  ;;  %p637_p7 = scmp.lt.s32.totalorder %s902_s23, 2 }
  0x1a   : > { %p45_p10 = scmp.eq.s32.totalorder %s42_s13, 0  ;;  %s239_s14 = sand.u32 1, %s890_s20  }
  0x1b   : > { %s596_s15 = sshll.u32 %s239_s14, 3  ;;  %s597_s17 = sshll.u32 %s898_s22, 3 }
  0x1c   : > { %s1022_s16 = scalar_select %p45_p10, %s890_s20, %s47_s10  }
  0x1d   : > { %s248_s30 = scalar_lea.hbm %s1149_s0, %s597_s17  ;;  %s243_s7 = scalar_lea.vmem [#allocation2], %s596_s15 }
  0x1e   : > { %s252_s8 = sshll.u32 %s243_s7, 4  ;;  %s250_s25 = sshll.u32 %s248_s30, 4  ;;  %s253_s8 = int_to_ptr.vmem [resolvable:$true] %s252_s8  ;;  %s251_s25 = int_to_ptr.hbm [resolvable:$true] %s250_s25 }
  0x1f   : > { %p623_p2 = pnand %p637_p7, %p1007_p3  ;;  %s240_s1 = scalar_lea.sflag [#allocation3], %s239_s14 }
  0x20   : > { %261 = sbr.rel (%p991_p8) target bundleno = 117 (0x75), region = 32  ;;  %s1033_s10 = sand.u32 (!%p991_p8), 1, %s886_s19  }
  0x21   : > { %625 = dma.hbm_to_vmem [thread:$0]  (!%p623_p2), %s251_s25, 128, %s253_s8, %s240_s1  }
  0x22   : > { %s599_s13 = sshll.u32 (!%p991_p8), %s1033_s10, 3  ;;  %s264_s15 = scalar_lea.sflag (!%p991_p8), [#allocation3], %s1033_s10 }
  0x23   : > { %s267_s17 = scalar_lea.vmem (!%p991_p8), [#allocation2], %s599_s13 }
  0x25   : > { %865 = dma.done.wait (%p978_p4), %s264_s15, 128  }
  0x26   : > { %867 = vsyncadd (%p978_p4), %s264_s15, 4294967168 }
  0x27   : > { %869 = dma.done.wait (%p61_p1), [#allocation6], 16  }
  0x28   : > { %871 = vsyncadd (%p61_p1), [#allocation6], 4294967280  ;;  %v905_v0 = vmov 8.0   ;;  %vm315_vm0 = vcmask 261120   ;;  %v314_v2 = vld [vmem:[%s267_s17] sm:$0xff]  ;;  %s413_s26 = scalar_lea.hbm %s1153_s4, %s894_s21  ;;  %s304_s6 = scalar_lea.vmem [#allocation8], %s1033_s10 }
  0x29   : > { %692 = vrcp.f32 %v905_v0  ;;  %v316_v3 = vsel %vm315_vm0, %v314_v2, 0.0  ;;  %s415_s11 = sshll.u32 %s304_s6, 4  ;;  %s384_s14 = sand.u32 1, %s967_s24   ;;  %vm376_vm2 = vcmask 253952   ;;  %s416_s11 = int_to_ptr.vmem [resolvable:$true] %s415_s11 }
  0x2a   : > { %v317_v5 = vrot.slane %v316_v3, 4  ;;  %s417_s28 = sshll.u32 %s413_s26, 4  ;;  %s1055_s29 = scalar_lea.sflag [#allocation9], %s384_s14  ;;  %s418_s28 = int_to_ptr.hbm [resolvable:$true] %s417_s28 }
  0x2b   : > { %s770_s30 = sshra.s32 %s418_s28, 4  ;;  %s776_s15 = scalar_lea.hbm %s1153_s4, 2  ;;  %s771_s30 = int_to_ptr.hbm [resolvable:$true] %s770_s30 }
  0x2c   : > { %v318_v7 = vadd.f32 %v317_v5, %v316_v3  ;;  %s772_s7 = scalar_lea.hbm %s771_s30, 1  ;;  %p777_p11 = scmp.lt.s32.totalorder %s771_s30, %s1153_s4 }
  0x2d   : > { %p773_p1 = scmp.ne.s32.totalorder %s771_s30, %s772_s7  ;;  %p778_p12 = scmp.lt.s32.totalorder %s776_s15, %s772_s7 }
  0x2e   : > { %v319_v9 = vrot.slane %v318_v7, 2 }
  0x2f   : > { %v693_v1 = vpop.eup %692  ;;  %p774_p4 = pnand %p773_p1, %p1013_p5  ;;  %p779_p13 = por %p778_p12, %p777_p11 }
  0x30   : > { %v324_v4 = vmul.f32 8.0, %v693_v1  ;;  %v320_v11 = vadd.f32 %v319_v9, %v318_v7  ;;  %vm328_vm1 = vweird.f32 %v693_v1 }
  0x31   : > { %p775_p8 = pneg %p774_p4 }
  0x32   : > { %v325_v6 = vsub.f32 1.0, %v324_v4  ;;  %v321_v12 = vrot.slane %v320_v11, 1 }
  0x33   : > { %p780_p0 = pnand %p779_p13, %p775_p8 }
  0x34   : > { %v326_v8 = vmul.f32 %v693_v1, %v325_v6  ;;  %v322_v14 = vadd.f32 %v321_v12, %v320_v11 }
  0x36   : > { %v327_v10 = vadd.f32 %v693_v1, %v326_v8 }
  0x38   : > { %v329_v13 = vsel %vm328_vm1, %v693_v1, %v327_v10 }
  0x39   : > { %v330_v15 = vmul.f32 %v329_v13, %v322_v14 }
  0x3b   : > { %v331_v16 = vsub.f32 %v314_v2, %v330_v15  ;;  %377 = vst.msk [vmem:[%s304_s6] sm:$0x1] %vm376_vm2, %v330_v15 }
  0x3c   : > { %783 = shalt.err (!%p780_p0)
}
  0x3d   : > { %613 = dma.vmem_to_hbm [thread:$0]  (%p1013_p5), %s416_s11, 16, %s418_s28, %s1055_s29   ;;  %v332_v17 = vmul.f32 %v331_v16, %v331_v16  ;;  %v690_v33 = vld [vmem:[#allocation5] ss:$0 sm:$0xff]  ;;  %v691_v38 = vld [vmem:[%s1151_s2] ss:$0 sm:$0xff] }
  0x3e   : > { %s603_s25 = sshll.u32 %s894_s21, 3  ;;  %s427_s11 = scalar_lea.hbm %s1154_s5, %s894_s21 }
  0x3f   : > { %v333_v18 = vsel %vm315_vm0, %v332_v17, 0.0  ;;  %s399_s30 = scalar_lea.hbm %s1152_s3, %s603_s25  ;;  %s310_s7 = scalar_lea.vmem [#allocation10], %s1033_s10 }
  0x40   : > { %v334_v19 = vrot.slane %v333_v18, 4  ;;  %s1078_s8 = sshll.u32 %s310_s7, 4  ;;  %s1080_s24 = sshll.u32 %s427_s11, 4  ;;  %s430_s8 = int_to_ptr.vmem [resolvable:$true] %s1078_s8  ;;  %s432_s24 = int_to_ptr.hbm [resolvable:$true] %s1080_s24 }
  0x41   : > { %s1084_s15 = scalar_lea.vmem [#allocation7], %s599_s13  ;;  %s403_s25 = sshll.u32 %s399_s30, 4  ;;  %s1095_s25 = int_to_ptr.hbm [resolvable:$true] %s403_s25 }
  0x42   : > { %v335_v20 = vadd.f32 %v334_v19, %v333_v18  ;;  %s401_s21 = sshll.u32 %s1084_s15, 4  ;;  %s798_s13 = sshra.s32 %s432_s24, 4  ;;  %s1092_s21 = int_to_ptr.vmem [resolvable:$true] %s401_s21  ;;  %s799_s13 = int_to_ptr.hbm [resolvable:$true] %s798_s13 }
  0x43   : > { %s800_s26 = scalar_lea.hbm %s799_s13, 1  ;;  %s804_s14 = scalar_lea.hbm %s1154_s5, 2 }
  0x44   : > { %v336_v21 = vrot.slane %v335_v20, 2  ;;  %p801_p3 = scmp.ne.s32.totalorder %s799_s13, %s800_s26  ;;  %p805_p2 = scmp.lt.s32.totalorder %s799_s13, %s1154_s5 }
  0x45   : > { %p806_p1 = scmp.lt.s32.totalorder %s804_s14, %s800_s26 }
  0x46   : > { %v337_v22 = vadd.f32 %v336_v21, %v335_v20  ;;  %p802_p7 = pnand %p801_p3, %p1013_p5 }
  0x47   : > { %p807_p4 = por %p806_p1, %p805_p2 }
  0x48   : > { %v338_v23 = vrot.slane %v337_v22, 1  ;;  %p803_p10 = pneg %p802_p7 }
  0x4a   : > { %v339_v24 = vadd.f32 %v338_v23, %v337_v22  ;;  %p808_p8 = pnand %p807_p4, %p803_p10 }
  0x4c   : > { %v340_v25 = vmul.f32 %v339_v24, %v329_v13 }
  0x4e   : > { %v341_v26 = vadd.f32 1e-05, %v340_v25 }
  0x50   : > { %694 = vrsqrt.f32 %v341_v26  ;;  %vm360_vm3 = vweird.f32 %v341_v26  ;;  %vm349_vm6 = vcmp.eq.f32.partialorder %v341_v26, inf  ;;  %v352_v34 = vand.u32 2147483648, %v341_v26 }
  0x51   : > { %vm351_vm7 = vcmp.eq.f32.partialorder %v341_v26, 0.0 }
  0x56   : > { %v695_v27 = vpop.eup %694 }
  0x57   : > { %v343_v28 = vmul.f32 %v695_v27, %v341_v26  ;;  %vm361_vm4 = vweird.f32 %v695_v27 }
  0x58   : > { %vm362_vm5 = vmor %vm360_vm3, %vm361_vm4 }
  0x59   : > { %v344_v29 = vmul.f32 %v695_v27, %v343_v28 }
  0x5b   : > { %v345_v30 = vmul.f32 0.5, %v344_v29 }
  0x5d   : > { %v346_v31 = vsub.f32 1.5, %v345_v30 }
  0x5f   : > { %v347_v32 = vmul.f32 %v695_v27, %v346_v31 }
  0x61   : > { %v363_v35 = vsel %vm362_vm5, %v695_v27, %v347_v32  ;;  %v348_v36 = vmul.f32 %v347_v32, %v341_v26 }
  0x62   : > { %v364_v37 = vmul.f32 %v363_v35, %v331_v16 }
  0x63   : > { %v350_v39 = vsel %vm349_vm6, %v341_v26, %v348_v36 }
  0x64   : > { %v369_v40 = vmul.f32 %v690_v33, %v364_v37  ;;  %v353_v41 = vsel %vm351_vm7, %v352_v34, %v350_v39 }
  0x65   : > { %378 = vst.msk [vmem:[%s310_s7] sm:$0x1] %vm376_vm2, %v353_v41 }
  0x66   : > { %v374_v42 = vadd.f32 %v691_v38, %v369_v40 }
  0x67   : > { %811 = shalt.err (!%p808_p8)
}
  0x68   : > { %614 = dma.vmem_to_hbm [thread:$0]  (%p1013_p5), %s430_s8, 16, %s432_s24, %s1055_s29   ;;  %375 = vst.msk [vmem:[%s1084_s15] sm:$0xff] %vm315_vm0, %v374_v42 }
  0x69   : > { %s380_s7 = scalar_lea.sflag [#allocation4], %s1033_s10  ;;  %s826_s17 = sshra.s32 %s1095_s25, 4  ;;  %s827_s17 = int_to_ptr.hbm [resolvable:$true] %s826_s17 }
  0x6a   : > { %s828_s1 = scalar_lea.hbm %s827_s17, 8  ;;  %s832_s6 = scalar_lea.hbm %s1152_s3, 16 }
  0x6b   : > { %p829_p11 = scmp.ne.s32.totalorder %s827_s17, %s828_s1  ;;  %p833_p0 = scmp.lt.s32.totalorder %s827_s17, %s1152_s3 }
  0x6c   : > { %p834_p3 = scmp.lt.s32.totalorder %s832_s6, %s828_s1 }
  0x6d   : > { %p830_p12 = pnand %p829_p11, %p1013_p5 }
  0x6e   : > { %p835_p7 = por %p834_p3, %p833_p0 }
  0x6f   : > { %p831_p13 = pneg %p830_p12 }
  0x71   : > { %p836_p10 = pnand %p835_p7, %p831_p13 }
  0x73   : > { %839 = shalt.err (!%p836_p10)
}
  0x74   : > { %612 = dma.vmem_to_hbm [thread:$0]  (%p1013_p5), %s1092_s21, 128, %s1095_s25, %s380_s7  }
  0x75 PF: > { %s443_s10 = sand.u32 1, %s882_s18   ;;  %p627_p2 = pnand %p595_p9, %p983_p6 }
  0x76   : > { %s444_s29 = scalar_lea.sflag [#allocation4], %s443_s10 }
  0x77   : > { %p628_p1 = pneg %p627_p2 }
  0x79   : > { %873 = dma.done.wait (%p628_p1), %s444_s29, 128  }
  0x7a   : > { %875 = vsyncadd (%p628_p1), %s444_s29, 4294967168  ;;  %s1163_s8 = sadd.s32 4294967294, %s902_s23  }
  0x7b   : > { %s453_s24 = sand.u32 1, %s1163_s8  }
  0x7c   : > { %s454_s15 = scalar_lea.sflag [#allocation9], %s453_s24 }
  0x7d   : > { %877 = dma.done.wait (%p628_p1), %s454_s15, 32  }
  0x7e   : > { %879 = vsyncadd (%p628_p1), %s454_s15, 4294967264  ;;  %s26_s23 = sadd.s32 1, %s902_s23   ;;  %s1164_s18 = smov %s886_s19 }
  0x7f   : > { %p23_p5 = scmp.ge.s32.totalorder %s26_s23, 4   ;;  %s1165_s19 = smov %s890_s20 }
  0x80   : > { %s1166_s20 = smov %s1022_s16  ;;  %s1167_s21 = smov %s898_s22 }
  0x81   : > { %s1168_s22 = smov %s1170_s9  ;;  %25 = sbr.rel (!%p23_p5) target bundleno = 11 (0xb), region = 117 }
  0x86   :  { %468 = vsyncpa [#allocation3], 1 }
  0x87   :  { %470 = vsyncpa [#allocation3 + $0x1], 1 }
  0x88   :  { %471 = vsyncpa [#allocation6], 1 }
  0x89   :  { %472 = vsyncpa [#allocation4], 1 }
  0x8a   :  { %474 = vsyncpa [#allocation4 + $0x1], 1 }
  0x8b   :  { %475 = vsyncpa [#allocation9], 1 }
  0x8c   :  { %477 = vsyncpa [#allocation9 + $0x1], 1 }

</bundles_post_ra>
